<compile_context>
chip_gen: v7x
topology: tpu7x:2x2x1
jax: 0.10.0
libtpu: 0.0.40
codegen_flags: <defaults>
</compile_context>

<pallas_src>
import jax
import jax.numpy as jnp
from jax.experimental import pallas as pl
from jax.experimental.pallas import tpu as pltpu


def _round_up(x, m):
    return ((x + m - 1) // m) * m


# ----------------------------------------------------------------------------
# Init-time parameter setup (plain JAX glue, runs once — QDQLinear.qdq_weight).
# ----------------------------------------------------------------------------
def quant_dequant_w(w, num_bits=8):
    """Per-output-channel symmetric int8 fake-quant of the Linear weight
    (neural_compressor smooth_quant.quant_dequant_w).  w: (N, K) float32."""
    eps = jnp.finfo(jnp.float32).eps
    q_min = -(2.0 ** (num_bits - 1))
    q_max = 2.0 ** (num_bits - 1) - 1.0
    x_max = jnp.max(jnp.abs(w), axis=1)                       # per output channel
    scale = x_max / ((q_max - q_min) / 2.0)
    scale = jnp.clip(scale, eps, None)[:, None]                # (N, 1)
    q = jnp.clip(jnp.round(w / scale), q_min, q_max)
    return (q * scale).astype(w.dtype)


def prepare_qdq_linear_params(weight, bias):
    """Init-time: quant-dequantize the weight, transpose ONCE to (K, N) and
    store as bf16 for the MXU; bias reshaped to (1, N) f32."""
    w_qdq = quant_dequant_w(weight.astype(jnp.float32))        # (N, K)
    w_kn = jnp.asarray(w_qdq.T, dtype=jnp.bfloat16)            # (K, N)
    b2 = bias.astype(jnp.float32).reshape(1, -1)               # (1, N)
    return w_kn, b2


# ----------------------------------------------------------------------------
# Pass 1: activation quantize->dequantize (quint8 fake-quant), once per element.
# zero_point folded into the clip bounds:
#   (clip(round(x/s)+zp, 0, 255) - zp) * s == clip(round(x/s), -zp, 255-zp) * s
# ----------------------------------------------------------------------------
def _act_qdq_kernel(params_ref, x_ref, o_ref):
    inv_scale = params_ref[0]
    scale = params_ref[1]
    lo = params_ref[2]                       # 0   - zero_point
    hi = params_ref[3]                       # 255 - zero_point
    x = x_ref[...].astype(jnp.float32)
    q = jnp.clip(jnp.round(x * inv_scale), lo, hi)
    o_ref[...] = (q * scale).astype(o_ref.dtype)


# ----------------------------------------------------------------------------
# Pass 2: tiled matmul + bias on bf16 operands, f32 accumulation.
# ----------------------------------------------------------------------------
def _matmul_bias_single_k_kernel(x_ref, w_ref, b_ref, o_ref):
    acc = jnp.dot(x_ref[...], w_ref[...], preferred_element_type=jnp.float32)
    o_ref[...] = (acc + b_ref[...]).astype(o_ref.dtype)


def _matmul_bias_f32out_kernel(x_ref, w_ref, b_ref, o_ref):
    # f32 output: accumulate directly into the resident output block.
    k = pl.program_id(2)
    partial = jnp.dot(x_ref[...], w_ref[...], preferred_element_type=jnp.float32)

    @pl.when(k == 0)
    def _():
        o_ref[...] = b_ref[...] + partial

    @pl.when(k > 0)
    def _():
        o_ref[...] += partial


def _matmul_bias_acc_kernel(x_ref, w_ref, b_ref, o_ref, acc_ref):
    # Non-f32 output: keep an f32 VMEM accumulator.
    k = pl.program_id(2)

    @pl.when(k == 0)
    def _():
        acc_ref[...] = jnp.zeros_like(acc_ref)

    acc_ref[...] += jnp.dot(x_ref[...], w_ref[...],
                            preferred_element_type=jnp.float32)

    @pl.when(k == pl.num_programs(2) - 1)
    def _():
        o_ref[...] = (acc_ref[...] + b_ref[...]).astype(o_ref.dtype)


# ----------------------------------------------------------------------------
# Wrapper.
# ----------------------------------------------------------------------------
def qdq_linear(x, w_kn, bias2d, *, scale=1.0, zero_point=0,
               tile_m=512, tile_n=1024, tile_k=1024):
    """x: (M, K) float; w_kn: (K, N) bf16 (pre-QDQ'd, pre-transposed);
    bias2d: (1, N) f32.  Returns (M, N) in x.dtype."""
    orig_dtype = x.dtype
    M, K = x.shape
    K2, N = w_kn.shape
    assert K == K2
    assert bias2d.shape == (1, N)

    # Hardware-friendly tiles: M multiple of 16 (bf16 sublane pack), K/N
    # multiples of 128 (lane), clamped to the (rounded-up) problem size.
    tm = min(tile_m, _round_up(M, 16))
    tk = min(tile_k, _round_up(K, 128))
    tn = min(tile_n, _round_up(N, 128))

    # v7x has 2 TensorCores: when M fits one i-tile, split N into >=2 j-tiles
    # so both cores get work under ("parallel","parallel","arbitrary").
    if _round_up(M, tm) // tm == 1 and N > 128:
        tn = min(tn, _round_up((N + 1) // 2, 128))

    Mp, Kp, Np = _round_up(M, tm), _round_up(K, tk), _round_up(N, tn)

    if (Mp, Kp) != (M, K):
        # Zero-padded activations quantize/dequantize back to exactly 0
        # (zero_point lies inside [0,255]), so padding contributes nothing.
        x = jnp.pad(x, ((0, Mp - M), (0, Kp - K)))
    if (Kp, Np) != (K, N):
        w_kn = jnp.pad(w_kn, ((0, Kp - K), (0, Np - N)))
    if Np != N:
        bias2d = jnp.pad(bias2d, ((0, 0), (0, Np - N)))

    # Runtime quant params in SMEM -> one compiled kernel across scale/zp.
    params = jnp.array([1.0 / float(scale), float(scale),
                        0.0 - float(zero_point), 255.0 - float(zero_point)],
                       dtype=jnp.float32)

    # ---- Pass 1: QDQ the activations once, emit bf16. ----
    x_dq = pl.pallas_call(
        _act_qdq_kernel,
        out_shape=jax.ShapeDtypeStruct((Mp, Kp), jnp.bfloat16),
        grid_spec=pltpu.PrefetchScalarGridSpec(
            num_scalar_prefetch=0,
            grid=(Mp // tm, Kp // tk),
            in_specs=[
                pl.BlockSpec(memory_space=pltpu.MemorySpace.SMEM),
                pl.BlockSpec((tm, tk), lambda i, k: (i, k)),
            ],
            out_specs=pl.BlockSpec((tm, tk), lambda i, k: (i, k)),
        ),
        compiler_params=pltpu.CompilerParams(
            dimension_semantics=("parallel", "parallel")),
    )(params, x)

    # ---- Pass 2: tiled matmul + bias. ----
    num_k = Kp // tk
    out_is_f32 = (orig_dtype == jnp.float32)

    if num_k == 1:
        kernel = _matmul_bias_single_k_kernel
        scratch = ()
    elif out_is_f32:
        kernel = _matmul_bias_f32out_kernel
        scratch = ()
    else:
        kernel = _matmul_bias_acc_kernel
        scratch = (pltpu.VMEM((tm, tn), jnp.float32),)

    out_item = jnp.zeros((), orig_dtype).dtype.itemsize
    # Double-buffered pipeline footprint (+ scratch); stays well under v7x's
    # 32 MiB scoped / 64 MiB physical VMEM with the default tiles (~10 MiB).
    need = (2 * tm * tk * 2            # x_dq tiles (bf16)
            + 2 * tk * tn * 2          # w tiles (bf16)
            + 2 * 1 * tn * 4           # bias tiles
            + 2 * tm * tn * out_item   # output tiles
            + (tm * tn * 4 if scratch else 0))
    vmem_limit = int(min(max(need + (4 << 20), 16 << 20), 30 << 20))

    cost = pl.CostEstimate(
        flops=2 * Mp * Np * Kp,
        transcendentals=0,
        bytes_accessed=(Mp * Kp * 2 * (Np // tn)   # x_dq re-read per j-tile
                        + Kp * Np * 2              # W (bf16)
                        + Np * 4                   # bias
                        + Mp * Np * out_item),     # Y
    )

    out = pl.pallas_call(
        kernel,
        out_shape=jax.ShapeDtypeStruct((Mp, Np), orig_dtype),
        grid_spec=pltpu.PrefetchScalarGridSpec(
            num_scalar_prefetch=0,
            grid=(Mp // tm, Np // tn, num_k),
            in_specs=[
                pl.BlockSpec((tm, tk), lambda i, j, k: (i, k)),
                pl.BlockSpec((tk, tn), lambda i, j, k: (k, j)),
                pl.BlockSpec((1, tn), lambda i, j, k: (0, j)),
            ],
            out_specs=pl.BlockSpec((tm, tn), lambda i, j, k: (i, j)),
            scratch_shapes=scratch,
        ),
        compiler_params=pltpu.CompilerParams(
            dimension_semantics=("parallel", "parallel", "arbitrary"),
            vmem_limit_bytes=vmem_limit),
        cost_estimate=cost,
    )(x_dq, w_kn, bias2d)

    return out[:M, :N]


# ----------------------------------------------------------------------------
# References (pure JAX) for sanity checks.
# ----------------------------------------------------------------------------
def _fake_quant_act(x, scale, zero_point):
    q = jnp.clip(jnp.round(x / scale) + zero_point, 0.0, 255.0)
    return (q - zero_point) * scale


def qdq_linear_ref_f32(x, weight_qdq, bias, *, scale=1.0, zero_point=0):
    x_dq = _fake_quant_act(x, scale, zero_point)
    return x_dq @ weight_qdq.T + bias


def qdq_linear_ref_bf16(x, weight_qdq, bias, *, scale=1.0, zero_point=0):
    x_dq = _fake_quant_act(x, scale, zero_point)
    acc = jnp.dot(x_dq.astype(jnp.bfloat16),
                  weight_qdq.T.astype(jnp.bfloat16),
                  preferred_element_type=jnp.float32)
    return acc + bias


if __name__ == "__main__":
    key = jax.random.PRNGKey(0)
    batch, seq, in_features, out_features = 2, 8, 32, 32

    k1, k2, k3 = jax.random.split(key, 3)
    # Scale activations up so the quint8 clamp/round path is exercised.
    x = jax.random.normal(k1, (batch, seq, in_features), jnp.float32) * 20.0 + 30.0
    w = jax.random.normal(k2, (out_features, in_features), jnp.float32) * 0.1
    b = jax.random.normal(k3, (out_features,), jnp.float32) * 0.1

    # Module __init__: qdq_weight() replaces the Linear weight; layout glue
    # (transpose + bf16 cast) done once here, not per forward call.
    w_kn, b2 = prepare_qdq_linear_params(w, b)

    x2d = x.reshape(batch * seq, in_features)
    out = qdq_linear(x2d, w_kn, b2, scale=1.0, zero_point=0)
    out = jax.block_until_ready(out)

    w_qdq = quant_dequant_w(w)
    ref_bf16 = qdq_linear_ref_bf16(x2d, w_qdq, b, scale=1.0, zero_point=0)
    ref_f32 = qdq_linear_ref_f32(x2d, w_qdq, b, scale=1.0, zero_point=0)

    assert out.shape == (batch * seq, out_features)
    # Tight check vs the bf16-operand reference (same numerics as the kernel).
    assert jnp.allclose(out, ref_bf16, atol=1e-3, rtol=1e-3), \
        "mismatch vs bf16 reference"
    # Loose semantic check vs the full-f32 reference (bf16 casts only
    # introduce <=2^-8 relative error on already-QDQ'd operands).
    assert jnp.allclose(out, ref_f32, atol=1.0, rtol=2e-2), \
        "mismatch vs f32 reference"

    print("KERNEL_OK")
</pallas_src>

<mosaic_0001>
module attributes {stable_mosaic.version = 11 : i64} {
  func.func @_act_qdq_kernel(%arg0: i32, %arg1: i32, %arg2: memref<4xf32, #tpu.memory_space<smem>>, %arg3: memref<16x128xf32, #tpu.memory_space<vmem>>, %arg4: memref<16x128xbf16, #tpu.memory_space<vmem>>) attributes {dimension_semantics = [#tpu.dimension_semantics<parallel>, #tpu.dimension_semantics<parallel>], iteration_bounds = array<i64: 1, 1>, scalar_prefetch = 0 : i64, scratch_operands = 0 : i64, tpu.core_type = #tpu.core_type<tc>, window_params = [{transform_indices = @transform_0, window_bounds = array<i64: 4>}, {transform_indices = @transform_1, window_bounds = array<i64: 16, 128>}, {transform_indices = @transform_2, window_bounds = array<i64: 16, 128>}]} {
    %c0 = arith.constant 0 : index
    %0 = memref.load %arg2[%c0] : memref<4xf32, #tpu.memory_space<smem>>
    %c1 = arith.constant 1 : index
    %1 = memref.load %arg2[%c1] : memref<4xf32, #tpu.memory_space<smem>>
    %c2 = arith.constant 2 : index
    %2 = memref.load %arg2[%c2] : memref<4xf32, #tpu.memory_space<smem>>
    %c3 = arith.constant 3 : index
    %3 = memref.load %arg2[%c3] : memref<4xf32, #tpu.memory_space<smem>>
    %c0_0 = arith.constant 0 : index
    %c0_1 = arith.constant 0 : index
    %4 = vector.load %arg3[%c0_0, %c0_1] : memref<16x128xf32, #tpu.memory_space<vmem>>, vector<16x128xf32>
    %5 = vector.broadcast %0 : f32 to vector<16x128xf32>
    %6 = arith.mulf %4, %5 : vector<16x128xf32>
    %7 = math.roundeven %6 : vector<16x128xf32>
    %8 = vector.broadcast %2 : f32 to vector<16x128xf32>
    %9 = arith.maximumf %8, %7 : vector<16x128xf32>
    %10 = vector.broadcast %3 : f32 to vector<16x128xf32>
    %11 = arith.minimumf %10, %9 : vector<16x128xf32>
    %12 = vector.broadcast %1 : f32 to vector<16x128xf32>
    %13 = arith.mulf %11, %12 : vector<16x128xf32>
    %14 = arith.truncf %13 : vector<16x128xf32> to vector<16x128xbf16>
    %c0_2 = arith.constant 0 : index
    %c0_3 = arith.constant 0 : index
    %15 = vector.load %arg4[%c0_2, %c0_3] : memref<16x128xbf16, #tpu.memory_space<vmem>>, vector<16x128xbf16>
    tpu.vector_store %arg4[%c0_2, %c0_3], %14 {strides = array<i32>} : memref<16x128xbf16, #tpu.memory_space<vmem>>, vector<16x128xbf16>,
    return
  }
  func.func @transform_0(%arg0: i32, %arg1: i32) -> i32 {
    %c0_i32 = arith.constant 0 : i32
    %c0_i32_0 = arith.constant 0 : i32
    return %c0_i32 : i32
  }
  func.func @transform_1(%arg0: i32, %arg1: i32) -> (i32, i32) {
    %c0_i32 = arith.constant 0 : i32
    return %arg0, %arg1 : i32, i32
  }
  func.func @transform_2(%arg0: i32, %arg1: i32) -> (i32, i32) {
    %c0_i32 = arith.constant 0 : i32
    return %arg0, %arg1 : i32, i32
  }
}

</mosaic_0001>

<bundles_post_ra>
// kernel: tpu_custom_call.1
= control target key start
LH: loop header
LB: loop body
LE: loop exit
PB: predicated region body
PF: predicated region fallthrough
CT: control target
= control target key end

     0   :  { %7 = vsyncpa [#allocation5], 0  ;;  %s224_s0 = inlined_call_operand.hbm [shape: f32[4], index: 0, kind: input, shape index: {}]   ;;  %s225_s1 = inlined_call_operand.hbm [shape: f32[16,128], index: 1, kind: input, shape index: {}]   ;;  %s226_s2 = inlined_call_operand.hbm [shape: bf16[16,128], index: 2, kind: output, shape index: {}]  }
   0x1   :  { %8 = vsyncpa [#allocation3], 0 }
   0x2   :  { %9 = vsyncpa [#allocation4], 0  ;;  %s106_s11 = scalar_lea.hbm %s224_s0, 16 }
   0x3   :  { %p107_p0 = scmp.ne.s32.totalorder %s224_s0, %s106_s11  ;;  %p110_p1 = scmp.lt.u32.totalorder %s106_s11, %s224_s0 }
   0x5   :  { %p112_p2 = pnand %p110_p1, %p107_p0 }
   0x7   :  { %115 = shalt.err (!%p112_p2)
}
   0x8   :  { %s166_s16 = smov [#allocation2]   ;;  %s167_s19 = smov [#allocation6]  }
   0x9   :  { %17 = dma.hbm_to_smem %s224_s0, 16, %s166_s16, [#allocation5]  }
   0xa   :  { %s23_s20 = sshll.u32 %s167_s19, 4  ;;  %s116_s23 = scalar_lea.hbm %s225_s1, 256  ;;  %s24_s20 = int_to_ptr.vmem [resolvable:$true] %s23_s20 }
   0xb   :  { %p117_p3 = scmp.ne.s32.totalorder %s225_s1, %s116_s23  ;;  %p120_p4 = scmp.lt.u32.totalorder %s116_s23, %s225_s1 }
   0xd   :  { %p122_p5 = pnand %p120_p4, %p117_p3 }
   0xf   :  { %125 = shalt.err (!%p122_p5)
}
  0x10   :  { %s126_s28 = scalar_lea.vmem %s24_s20, 256  ;;  %p131_p7 = scmp.lt.s32.totalorder %s24_s20, %s24_s20 }
  0x11   :  { %p127_p6 = scmp.ne.s32.totalorder %s24_s20, %s126_s28  ;;  %p132_p8 = scmp.lt.s32.totalorder %s126_s28, %s126_s28 }
  0x13   :  { %p133_p9 = por %p132_p8, %p131_p7 }
  0x15   :  { %p134_p10 = pnand %p133_p9, %p127_p6 }
  0x17   :  { %137 = shalt.err (!%p134_p10)
}
  0x18   :  { %s168_s0 = smov 128   ;;  %s169_s29 = smov 8  }
  0x19   :  { %29 = dma.hbm_to_vmem [thread:$0]  %s225_s1, 256, %s24_s20, [#allocation3], %s168_s0, %s168_s0, %s169_s29  }
  0x1a   :  { %160 = dma.done.wait [#allocation5], 16  }
  0x1b   :  { %161 = vsyncadd [#allocation5], 4294967280 }
  0x1c   :  { %162 = dma.done.wait [#allocation3], 256  }
  0x1d   :  { %163 = vsyncadd [#allocation3], 4294967040 }
  0x1e   :  { %36 = sfence }
  0x1f   :  { %s37_s4 = sld [smem:[#allocation2]]  ;;  %s86_s5 = sld [smem:[#allocation2 + $0x2]]  ;;  %v41_v0 = vld [vmem:[#allocation6] sm:$0xff]  ;;  %v42_v1 = vld [vmem:[#allocation6 + $0x8] sm:$0xff] }
  0x20   :  { %s87_s6 = sld [smem:[#allocation2 + $0x3]]  ;;  %s85_s7 = sld [smem:[#allocation2 + $0x1]] }
  0x21   :  { %s170_s1 = smov [#allocation7]  }
  0x22   :  { %s72_s8 = sshll.u32 %s170_s1, 4  ;;  %s73_s8 = int_to_ptr.vmem [resolvable:$true] %s72_s8 }
  0x23   :  { %s138_s9 = scalar_lea.vmem %s73_s8, 128  ;;  %p143_p12 = scmp.lt.s32.totalorder %s73_s8, %s73_s8 }
  0x24   :  { %p139_p11 = scmp.ne.s32.totalorder %s73_s8, %s138_s9  ;;  %p144_p13 = scmp.lt.s32.totalorder %s138_s9, %s138_s9 }
  0x25   :  { %v43_v2 = vstv %s37_s4  ;;  %v48_v5 = vstv %s86_s5 }
  0x26   :  { %v44_v3 = vmul.f32 %v43_v2, %v41_v0  ;;  %v45_v4 = vmul.f32 %v43_v2, %v42_v1  ;;  %v51_v8 = vstv %s87_s6  ;;  %v54_v11 = vstv %s85_s7  ;;  %p145_p0 = por %p144_p13, %p143_p12 }
  0x28   :  { %v97_v6 = vround.rtne.f32 %v44_v3  ;;  %v98_v7 = vround.rtne.f32 %v45_v4  ;;  %p146_p1 = pnand %p145_p0, %p139_p11 }
  0x2a   :  { %v49_v9 = vmax.f32 %v48_v5, %v97_v6  ;;  %v50_v10 = vmax.f32 %v48_v5, %v98_v7 }
  0x2c   :  { %v52_v12 = vmin.f32 %v51_v8, %v49_v9  ;;  %v53_v13 = vmin.f32 %v51_v8, %v50_v10 }
  0x2e   :  { %v55_v14 = vmul.f32 %v54_v11, %v52_v12  ;;  %v56_v15 = vmul.f32 %v54_v11, %v53_v13 }
  0x30   :  { %v95_v16 = vpack.c.bf16 %v56_v15, %v55_v14 }
  0x32   :  { %96 = vst [vmem:[#allocation7] sm:$0xff] %v95_v16  }
  0x33   :  { %149 = shalt.err (!%p146_p1)
}
  0x34   :  { %s150_s12 = scalar_lea.hbm %s226_s2, 128 }
  0x35   :  { %p151_p2 = scmp.ne.s32.totalorder %s226_s2, %s150_s12  ;;  %p154_p3 = scmp.lt.u32.totalorder %s150_s12, %s226_s2 }
  0x37   :  { %p156_p4 = pnand %p154_p3, %p151_p2 }
  0x39   :  { %159 = shalt.err (!%p156_p4)
}
  0x3a   :  { %s171_s17 = smov 64   ;;  %s172_s18 = smov 4  }
  0x3b   :  { %78 = dma.vmem_to_hbm [thread:$0]  %s73_s8, 128, %s226_s2, [#allocation4], %s171_s17, %s171_s17, %s172_s18  }
  0x3c   :  { %164 = dma.done.wait [#allocation4], 128  }
  0x3d   :  { %165 = vsyncadd [#allocation4], 4294967168 }
  0x3e   :  { %82 = vsyncpa [#allocation3], 1 }
  0x3f   :  { %83 = vsyncpa [#allocation4], 1 }
  0x40   :  { %84 = vsyncpa [#allocation5], 1 }

</bundles_post_ra>
